<compile_context>
chip_gen: v7x
topology: tpu7x:2x2x1
jax: 0.10.0
libtpu: 0.0.40
codegen_flags: <defaults>
</compile_context>

<pallas_src>
import functools
import math

import jax
import jax.numpy as jnp
from jax.experimental import pallas as pl
from jax.experimental.pallas import tpu as pltpu

_TWO_PI = 2.0 * math.pi


def _source_kernel(ths_ref, tho_ref, uv_ref, noise_ref,
                   a_ref, b_ref, bias_ref, o_ref, *,
                   upp, dim, sine_amp, noise_std):
    # ths/tho/uv : (TILE_F, 1) f32   per-frame quantities (already 2*pi scaled)
    # noise/o    : (TILE_F, upp) f32 per-sample slabs (lane-dense)
    # a/b        : (dim,) f32 in SMEM,  bias: (1,) f32 in SMEM
    ths = ths_ref[...]          # 2*pi * f0 / sample_rate
    tho = tho_ref[...]          # 2*pi * accumulated phase at frame start
    uv = uv_ref[...]            # voiced / unvoiced flag

    # sample index inside each frame: 1..upp, on the lane axis
    k = (jax.lax.broadcasted_iota(jnp.int32, (1, upp), 1) + 1).astype(jnp.float32)
    theta = ths * k + tho                       # (TILE_F, upp): 2*pi*(f0/sr*k + phase)

    # Harmonic stack via the angle-addition recurrence:
    #   sin(h*theta + phi_h) = sin(h*theta)*cos(phi_h) + cos(h*theta)*sin(phi_h)
    #   sin((h+1)*theta) = sin(h*theta)*cos(theta) + cos(h*theta)*sin(theta)
    #   cos((h+1)*theta) = cos(h*theta)*cos(theta) - sin(h*theta)*sin(theta)
    # -> only 2 transcendentals total; a_h/b_h fold sine_amp*W[h]*{cos,sin}(phi_h).
    s1 = jnp.sin(theta)
    c1 = jnp.cos(theta)
    s, c = s1, c1
    merged = a_ref[0] * s + b_ref[0] * c
    for h in range(1, dim):                     # unrolled, dim = harmonic_num + 1
        s, c = s * c1 + c * s1, c * c1 - s * s1
        merged = merged + a_ref[h] * s + b_ref[h] * c

    # noise mixing (noise was already projected through W in the wrapper) + bias + tanh
    noise_scale = uv * noise_std + (1.0 - uv) * (sine_amp / 3.0)
    pre = uv * merged + noise_scale * noise_ref[...] + bias_ref[0]
    o_ref[...] = jnp.tanh(pre).astype(o_ref.dtype)


def _pick_tile_frames(T, upp, itemsize=4, target_bytes=2 << 20):
    """Largest TILE_F dividing T with (TILE_F % 8 == 0 or TILE_F == T), tile <= ~2 MiB."""
    cands = [tf for tf in range(1, T + 1)
             if T % tf == 0 and (tf % 8 == 0 or tf == T)]
    fitting = [tf for tf in cands if tf * upp * itemsize <= target_bytes]
    return max(fitting) if fitting else min(cands)


def source_module_hn_nsf(f0, harm_noise, weight, bias, rand_ini, *,
                         upp, sample_rate, sine_amp=0.1, noise_std=0.003,
                         voiced_threshold=0.0):
    """Pallas forward of SourceModuleHnNSF.

    f0:         (B, T)          frame-rate F0 [Hz]
    harm_noise: (B, T*upp, dim) standard-normal noise (== torch.randn_like(sine_waves))
    weight:     (dim,)          l_linear.weight.reshape(-1)
    bias:       ()              l_linear.bias
    rand_ini:   (dim,)          random initial phases, rand_ini[0] == 0
    returns:    (B, T*upp, 1)
    """
    B, T = f0.shape
    dim = weight.shape[0]
    f0 = f0.astype(jnp.float32)
    w = weight.astype(jnp.float32)
    ri = rand_ini.astype(jnp.float32)

    # ---- tiny per-frame prep (plain JAX; sequential cumsum over frames) ----
    f0sr = f0 / float(sample_rate)                               # (B, T)
    rev = f0sr * float(upp)                                      # phase advance per frame
    tmp = jnp.fmod(rev[:, :-1] + 0.5, 1.0) - 0.5
    phase = jnp.pad(jnp.fmod(jnp.cumsum(tmp, axis=1), 1.0), ((0, 0), (1, 0)))
    uv = (f0 > voiced_threshold).astype(jnp.float32)             # (B, T)
    th_scale = _TWO_PI * f0sr
    th_off = _TWO_PI * phase

    # fold sine_amp * W * {cos,sin}(2*pi*rand_ini) into per-harmonic SMEM coefficients
    a_coef = float(sine_amp) * w * jnp.cos(_TWO_PI * ri)
    b_coef = float(sine_amp) * w * jnp.sin(_TWO_PI * ri)

    # Project per-harmonic noise through the Linear once (memory-bound pass):
    # Linear(sine*uv + scale*n) == uv*(sin @ amp*W) + scale*(n @ W) + b
    # TODO(synk): draw the noise in-kernel with pltpu.stateful_normal to avoid this
    # HBM read; kept external so the run matches the deterministic JAX reference.
    noise_proj = jnp.einsum("bsh,h->bs", harm_noise.astype(jnp.float32),
                            w).reshape(B, T, upp)

    tile_f = _pick_tile_frames(T, upp)
    grid = (B, T // tile_f)

    frame_spec = pl.BlockSpec((None, tile_f, 1), lambda b, t: (b, t, 0))
    slab_spec = pl.BlockSpec((None, tile_f, upp), lambda b, t: (b, t, 0))
    smem_spec = pl.BlockSpec(memory_space=pltpu.MemorySpace.SMEM)

    kernel = functools.partial(
        _source_kernel, upp=upp, dim=dim,
        sine_amp=float(sine_amp), noise_std=float(noise_std))

    out = pl.pallas_call(
        kernel,
        out_shape=jax.ShapeDtypeStruct((B, T, upp), jnp.float32),
        grid_spec=pltpu.PrefetchScalarGridSpec(
            num_scalar_prefetch=0,
            grid=grid,
            in_specs=[frame_spec, frame_spec, frame_spec, slab_spec,
                      smem_spec, smem_spec, smem_spec],
            out_specs=slab_spec,
        ),
        compiler_params=pltpu.CompilerParams(
            dimension_semantics=("parallel", "parallel"),
            vmem_limit_bytes=32 * 1024 * 1024),
    )(th_scale[..., None], th_off[..., None], uv[..., None], noise_proj,
      a_coef, b_coef, bias.reshape(1).astype(jnp.float32))

    return out.reshape(B, T * upp, 1)


def source_module_ref(f0, harm_noise, weight, bias, rand_ini, *,
                      upp, sample_rate, sine_amp=0.1, noise_std=0.003,
                      voiced_threshold=0.0):
    """Plain-JAX mirror of the PyTorch module (same noise / params)."""
    B, T = f0.shape
    dim = weight.shape[0]
    f0_ = f0.astype(jnp.float32)[..., None]                      # (B, T, 1)
    rad = f0_ / sample_rate * jnp.arange(1, upp + 1, dtype=jnp.float32)   # (B, T, upp)
    tmp = jnp.fmod(rad[:, :-1, -1:] + 0.5, 1.0) - 0.5
    cum = jnp.fmod(jnp.cumsum(tmp, axis=1), 1.0)
    rad = rad + jnp.pad(cum, ((0, 0), (1, 0), (0, 0)))
    rad = rad.reshape(B, -1, 1) * jnp.arange(1, dim + 1, dtype=jnp.float32)
    rad = rad + rand_ini.reshape(1, 1, dim)
    sine_waves = jnp.sin(2.0 * jnp.pi * rad) * sine_amp          # (B, S, dim)
    uv = (f0_ > voiced_threshold).astype(jnp.float32)            # (B, T, 1)
    uv = jnp.repeat(uv, upp, axis=1)                             # nearest upsample
    sine_waves = sine_waves * uv + \
        (uv * noise_std + (1.0 - uv) * sine_amp / 3.0) * harm_noise
    merged = sine_waves @ weight.reshape(dim, 1) + bias          # Linear(dim -> 1)
    return jnp.tanh(merged)                                      # (B, S, 1)


if __name__ == "__main__":
    key = jax.random.PRNGKey(0)
    k_f0, k_voice, k_noise, k_w, k_b, k_ri = jax.random.split(key, 6)

    B, T = 2, 16               # batch, frame count
    harmonic_num = 8
    dim = harmonic_num + 1
    upp = 128                  # upsample factor (frames -> audio samples)
    sample_rate = 16000
    sine_amp, noise_std, voiced_threshold = 0.1, 0.003, 0.0

    # frame-rate F0 with some unvoiced (zero) frames
    f0 = jax.random.uniform(k_f0, (B, T), minval=80.0, maxval=400.0)
    f0 = jnp.where(jax.random.uniform(k_voice, (B, T)) < 0.3, 0.0, f0)

    # module parameters (deterministic): Linear(dim -> 1) and random initial phases
    weight = jax.random.uniform(k_w, (dim,), minval=-1.0, maxval=1.0) / jnp.sqrt(dim * 1.0)
    bias = jax.random.uniform(k_b, (), minval=-0.3, maxval=0.3)
    rand_ini = jax.random.uniform(k_ri, (dim,)).at[0].set(0.0)

    # the noise the module draws with torch.randn_like(sine_waves); shared with the reference
    harm_noise = jax.random.normal(k_noise, (B, T * upp, dim), dtype=jnp.float32)

    out = source_module_hn_nsf(
        f0, harm_noise, weight, bias, rand_ini,
        upp=upp, sample_rate=sample_rate, sine_amp=sine_amp,
        noise_std=noise_std, voiced_threshold=voiced_threshold)
    out = jax.block_until_ready(out)

    ref = source_module_ref(
        f0, harm_noise, weight, bias, rand_ini,
        upp=upp, sample_rate=sample_rate, sine_amp=sine_amp,
        noise_std=noise_std, voiced_threshold=voiced_threshold)

    assert out.shape == (B, T * upp, 1)
    assert jnp.allclose(out, ref, atol=1e-3, rtol=1e-3), (
        f"max abs diff {jnp.max(jnp.abs(out - ref))}")
    print("KERNEL_OK")
</pallas_src>

<mosaic_0001>
module attributes {stable_mosaic.version = 11 : i64} {
  func.func @_source_kernel(%arg0: i32, %arg1: i32, %arg2: memref<1x16x1xf32, #tpu.memory_space<vmem>>, %arg3: memref<1x16x1xf32, #tpu.memory_space<vmem>>, %arg4: memref<1x16x1xf32, #tpu.memory_space<vmem>>, %arg5: memref<1x16x128xf32, #tpu.memory_space<vmem>>, %arg6: memref<9xf32, #tpu.memory_space<smem>>, %arg7: memref<9xf32, #tpu.memory_space<smem>>, %arg8: memref<1xf32, #tpu.memory_space<smem>>, %arg9: memref<1x16x128xf32, #tpu.memory_space<vmem>>) attributes {dimension_semantics = [#tpu.dimension_semantics<parallel>, #tpu.dimension_semantics<parallel>], iteration_bounds = array<i64: 2, 1>, scalar_prefetch = 0 : i64, scratch_operands = 0 : i64, tpu.core_type = #tpu.core_type<tc>, window_params = [{transform_indices = @transform_0, window_bounds = array<i64: 1, 16, 1>}, {transform_indices = @transform_1, window_bounds = array<i64: 1, 16, 1>}, {transform_indices = @transform_2, window_bounds = array<i64: 1, 16, 1>}, {transform_indices = @transform_3, window_bounds = array<i64: 1, 16, 128>}, {transform_indices = @transform_4, window_bounds = array<i64: 9>}, {transform_indices = @transform_5, window_bounds = array<i64: 9>}, {transform_indices = @transform_6, window_bounds = array<i64: 1>}, {transform_indices = @transform_7, window_bounds = array<i64: 1, 16, 128>}]} {
    %c0 = arith.constant 0 : index
    %c0_0 = arith.constant 0 : index
    %c0_1 = arith.constant 0 : index
    %0 = vector.load %arg2[%c0, %c0_0, %c0_1] : memref<1x16x1xf32, #tpu.memory_space<vmem>>, vector<1x16x1xf32>
    %1 = vector.shape_cast %0 : vector<1x16x1xf32> to vector<16x1xf32>
    %c0_2 = arith.constant 0 : index
    %c0_3 = arith.constant 0 : index
    %c0_4 = arith.constant 0 : index
    %2 = vector.load %arg3[%c0_2, %c0_3, %c0_4] : memref<1x16x1xf32, #tpu.memory_space<vmem>>, vector<1x16x1xf32>
    %3 = vector.shape_cast %2 : vector<1x16x1xf32> to vector<16x1xf32>
    %c0_5 = arith.constant 0 : index
    %c0_6 = arith.constant 0 : index
    %c0_7 = arith.constant 0 : index
    %4 = vector.load %arg4[%c0_5, %c0_6, %c0_7] : memref<1x16x1xf32, #tpu.memory_space<vmem>>, vector<1x16x1xf32>
    %5 = vector.shape_cast %4 : vector<1x16x1xf32> to vector<16x1xf32>
    %6 = tpu.iota {dimensions = array<i32: 1>} : vector<1x128xi32>
    %c1_i32 = arith.constant 1 : i32
    %7 = vector.broadcast %c1_i32 : i32 to vector<1x128xi32>
    %8 = arith.addi %6, %7 : vector<1x128xi32>
    %9 = arith.sitofp %8 : vector<1x128xi32> to vector<1x128xf32>
    %10 = vector.broadcast %1 : vector<16x1xf32> to vector<16x128xf32>
    %11 = vector.broadcast %9 : vector<1x128xf32> to vector<16x128xf32>
    %12 = arith.mulf %10, %11 : vector<16x128xf32>
    %13 = vector.broadcast %3 : vector<16x1xf32> to vector<16x128xf32>
    %14 = arith.addf %12, %13 : vector<16x128xf32>
    %15 = math.sin %14 : vector<16x128xf32>
    %16 = math.cos %14 : vector<16x128xf32>
    %c0_8 = arith.constant 0 : index
    %17 = memref.load %arg6[%c0_8] : memref<9xf32, #tpu.memory_space<smem>>
    %18 = vector.broadcast %17 : f32 to vector<16x128xf32>
    %19 = arith.mulf %18, %15 : vector<16x128xf32>
    %c0_9 = arith.constant 0 : index
    %20 = memref.load %arg7[%c0_9] : memref<9xf32, #tpu.memory_space<smem>>
    %21 = vector.broadcast %20 : f32 to vector<16x128xf32>
    %22 = arith.mulf %21, %16 : vector<16x128xf32>
    %23 = arith.addf %19, %22 : vector<16x128xf32>
    %24 = arith.mulf %15, %16 : vector<16x128xf32>
    %25 = arith.mulf %16, %15 : vector<16x128xf32>
    %26 = arith.addf %24, %25 : vector<16x128xf32>
    %27 = arith.mulf %16, %16 : vector<16x128xf32>
    %28 = arith.mulf %15, %15 : vector<16x128xf32>
    %29 = arith.subf %27, %28 : vector<16x128xf32>
    %c1 = arith.constant 1 : index
    %30 = memref.load %arg6[%c1] : memref<9xf32, #tpu.memory_space<smem>>
    %31 = vector.broadcast %30 : f32 to vector<16x128xf32>
    %32 = arith.mulf %31, %26 : vector<16x128xf32>
    %33 = arith.addf %23, %32 : vector<16x128xf32>
    %c1_10 = arith.constant 1 : index
    %34 = memref.load %arg7[%c1_10] : memref<9xf32, #tpu.memory_space<smem>>
    %35 = vector.broadcast %34 : f32 to vector<16x128xf32>
    %36 = arith.mulf %35, %29 : vector<16x128xf32>
    %37 = arith.addf %33, %36 : vector<16x128xf32>
    %38 = arith.mulf %26, %16 : vector<16x128xf32>
    %39 = arith.mulf %29, %15 : vector<16x128xf32>
    %40 = arith.addf %38, %39 : vector<16x128xf32>
    %41 = arith.mulf %29, %16 : vector<16x128xf32>
    %42 = arith.mulf %26, %15 : vector<16x128xf32>
    %43 = arith.subf %41, %42 : vector<16x128xf32>
    %c2 = arith.constant 2 : index
    %44 = memref.load %arg6[%c2] : memref<9xf32, #tpu.memory_space<smem>>
    %45 = vector.broadcast %44 : f32 to vector<16x128xf32>
    %46 = arith.mulf %45, %40 : vector<16x128xf32>
    %47 = arith.addf %37, %46 : vector<16x128xf32>
    %c2_11 = arith.constant 2 : index
    %48 = memref.load %arg7[%c2_11] : memref<9xf32, #tpu.memory_space<smem>>
    %49 = vector.broadcast %48 : f32 to vector<16x128xf32>
    %50 = arith.mulf %49, %43 : vector<16x128xf32>
    %51 = arith.addf %47, %50 : vector<16x128xf32>
    %52 = arith.mulf %40, %16 : vector<16x128xf32>
    %53 = arith.mulf %43, %15 : vector<16x128xf32>
    %54 = arith.addf %52, %53 : vector<16x128xf32>
    %55 = arith.mulf %43, %16 : vector<16x128xf32>
    %56 = arith.mulf %40, %15 : vector<16x128xf32>
    %57 = arith.subf %55, %56 : vector<16x128xf32>
    %c3 = arith.constant 3 : index
    %58 = memref.load %arg6[%c3] : memref<9xf32, #tpu.memory_space<smem>>
    %59 = vector.broadcast %58 : f32 to vector<16x128xf32>
    %60 = arith.mulf %59, %54 : vector<16x128xf32>
    %61 = arith.addf %51, %60 : vector<16x128xf32>
    %c3_12 = arith.constant 3 : index
    %62 = memref.load %arg7[%c3_12] : memref<9xf32, #tpu.memory_space<smem>>
    %63 = vector.broadcast %62 : f32 to vector<16x128xf32>
    %64 = arith.mulf %63, %57 : vector<16x128xf32>
    %65 = arith.addf %61, %64 : vector<16x128xf32>
    %66 = arith.mulf %54, %16 : vector<16x128xf32>
    %67 = arith.mulf %57, %15 : vector<16x128xf32>
    %68 = arith.addf %66, %67 : vector<16x128xf32>
    %69 = arith.mulf %57, %16 : vector<16x128xf32>
    %70 = arith.mulf %54, %15 : vector<16x128xf32>
    %71 = arith.subf %69, %70 : vector<16x128xf32>
    %c4 = arith.constant 4 : index
    %72 = memref.load %arg6[%c4] : memref<9xf32, #tpu.memory_space<smem>>
    %73 = vector.broadcast %72 : f32 to vector<16x128xf32>
    %74 = arith.mulf %73, %68 : vector<16x128xf32>
    %75 = arith.addf %65, %74 : vector<16x128xf32>
    %c4_13 = arith.constant 4 : index
    %76 = memref.load %arg7[%c4_13] : memref<9xf32, #tpu.memory_space<smem>>
    %77 = vector.broadcast %76 : f32 to vector<16x128xf32>
    %78 = arith.mulf %77, %71 : vector<16x128xf32>
    %79 = arith.addf %75, %78 : vector<16x128xf32>
    %80 = arith.mulf %68, %16 : vector<16x128xf32>
    %81 = arith.mulf %71, %15 : vector<16x128xf32>
    %82 = arith.addf %80, %81 : vector<16x128xf32>
    %83 = arith.mulf %71, %16 : vector<16x128xf32>
    %84 = arith.mulf %68, %15 : vector<16x128xf32>
    %85 = arith.subf %83, %84 : vector<16x128xf32>
    %c5 = arith.constant 5 : index
    %86 = memref.load %arg6[%c5] : memref<9xf32, #tpu.memory_space<smem>>
    %87 = vector.broadcast %86 : f32 to vector<16x128xf32>
    %88 = arith.mulf %87, %82 : vector<16x128xf32>
    %89 = arith.addf %79, %88 : vector<16x128xf32>
    %c5_14 = arith.constant 5 : index
    %90 = memref.load %arg7[%c5_14] : memref<9xf32, #tpu.memory_space<smem>>
    %91 = vector.broadcast %90 : f32 to vector<16x128xf32>
    %92 = arith.mulf %91, %85 : vector<16x128xf32>
    %93 = arith.addf %89, %92 : vector<16x128xf32>
    %94 = arith.mulf %82, %16 : vector<16x128xf32>
    %95 = arith.mulf %85, %15 : vector<16x128xf32>
    %96 = arith.addf %94, %95 : vector<16x128xf32>
    %97 = arith.mulf %85, %16 : vector<16x128xf32>
    %98 = arith.mulf %82, %15 : vector<16x128xf32>
    %99 = arith.subf %97, %98 : vector<16x128xf32>
    %c6 = arith.constant 6 : index
    %100 = memref.load %arg6[%c6] : memref<9xf32, #tpu.memory_space<smem>>
    %101 = vector.broadcast %100 : f32 to vector<16x128xf32>
    %102 = arith.mulf %101, %96 : vector<16x128xf32>
    %103 = arith.addf %93, %102 : vector<16x128xf32>
    %c6_15 = arith.constant 6 : index
    %104 = memref.load %arg7[%c6_15] : memref<9xf32, #tpu.memory_space<smem>>
    %105 = vector.broadcast %104 : f32 to vector<16x128xf32>
    %106 = arith.mulf %105, %99 : vector<16x128xf32>
    %107 = arith.addf %103, %106 : vector<16x128xf32>
    %108 = arith.mulf %96, %16 : vector<16x128xf32>
    %109 = arith.mulf %99, %15 : vector<16x128xf32>
    %110 = arith.addf %108, %109 : vector<16x128xf32>
    %111 = arith.mulf %99, %16 : vector<16x128xf32>
    %112 = arith.mulf %96, %15 : vector<16x128xf32>
    %113 = arith.subf %111, %112 : vector<16x128xf32>
    %c7 = arith.constant 7 : index
    %114 = memref.load %arg6[%c7] : memref<9xf32, #tpu.memory_space<smem>>
    %115 = vector.broadcast %114 : f32 to vector<16x128xf32>
    %116 = arith.mulf %115, %110 : vector<16x128xf32>
    %117 = arith.addf %107, %116 : vector<16x128xf32>
    %c7_16 = arith.constant 7 : index
    %118 = memref.load %arg7[%c7_16] : memref<9xf32, #tpu.memory_space<smem>>
    %119 = vector.broadcast %118 : f32 to vector<16x128xf32>
    %120 = arith.mulf %119, %113 : vector<16x128xf32>
    %121 = arith.addf %117, %120 : vector<16x128xf32>
    %122 = arith.mulf %110, %16 : vector<16x128xf32>
    %123 = arith.mulf %113, %15 : vector<16x128xf32>
    %124 = arith.addf %122, %123 : vector<16x128xf32>
    %125 = arith.mulf %113, %16 : vector<16x128xf32>
    %126 = arith.mulf %110, %15 : vector<16x128xf32>
    %127 = arith.subf %125, %126 : vector<16x128xf32>
    %c8 = arith.constant 8 : index
    %128 = memref.load %arg6[%c8] : memref<9xf32, #tpu.memory_space<smem>>
    %129 = vector.broadcast %128 : f32 to vector<16x128xf32>
    %130 = arith.mulf %129, %124 : vector<16x128xf32>
    %131 = arith.addf %121, %130 : vector<16x128xf32>
    %c8_17 = arith.constant 8 : index
    %132 = memref.load %arg7[%c8_17] : memref<9xf32, #tpu.memory_space<smem>>
    %133 = vector.broadcast %132 : f32 to vector<16x128xf32>
    %134 = arith.mulf %133, %127 : vector<16x128xf32>
    %135 = arith.addf %131, %134 : vector<16x128xf32>
    %cst = arith.constant 3.000000e-03 : f32
    %136 = vector.broadcast %cst : f32 to vector<16x1xf32>
    %137 = arith.mulf %5, %136 : vector<16x1xf32>
    %cst_18 = arith.constant 1.000000e+00 : f32
    %138 = vector.broadcast %cst_18 : f32 to vector<16x1xf32>
    %139 = arith.subf %138, %5 : vector<16x1xf32>
    %cst_19 = arith.constant 0.0333333351 : f32
    %140 = vector.broadcast %cst_19 : f32 to vector<16x1xf32>
    %141 = arith.mulf %139, %140 : vector<16x1xf32>
    %142 = arith.addf %137, %141 : vector<16x1xf32>
    %143 = vector.broadcast %5 : vector<16x1xf32> to vector<16x128xf32>
    %144 = arith.mulf %143, %135 : vector<16x128xf32>
    %c0_20 = arith.constant 0 : index
    %c0_21 = arith.constant 0 : index
    %c0_22 = arith.constant 0 : index
    %145 = vector.load %arg5[%c0_20, %c0_21, %c0_22] : memref<1x16x128xf32, #tpu.memory_space<vmem>>, vector<1x16x128xf32>
    %146 = vector.shape_cast %145 : vector<1x16x128xf32> to vector<16x128xf32>
    %147 = vector.broadcast %142 : vector<16x1xf32> to vector<16x128xf32>
    %148 = arith.mulf %147, %146 : vector<16x128xf32>
    %149 = arith.addf %144, %148 : vector<16x128xf32>
    %c0_23 = arith.constant 0 : index
    %150 = memref.load %arg8[%c0_23] : memref<1xf32, #tpu.memory_space<smem>>
    %151 = vector.broadcast %150 : f32 to vector<16x128xf32>
    %152 = arith.addf %149, %151 : vector<16x128xf32>
    %153 = math.tanh %152 : vector<16x128xf32>
    %c0_24 = arith.constant 0 : index
    %c0_25 = arith.constant 0 : index
    %c0_26 = arith.constant 0 : index
    %154 = vector.load %arg9[%c0_24, %c0_25, %c0_26] : memref<1x16x128xf32, #tpu.memory_space<vmem>>, vector<1x16x128xf32>
    %155 = vector.shape_cast %154 : vector<1x16x128xf32> to vector<16x128xf32>
    %156 = vector.shape_cast %153 : vector<16x128xf32> to vector<1x16x128xf32>
    tpu.vector_store %arg9[%c0_24, %c0_25, %c0_26], %156 {strides = array<i32>} : memref<1x16x128xf32, #tpu.memory_space<vmem>>, vector<1x16x128xf32>,
    return
  }
  func.func @transform_0(%arg0: i32, %arg1: i32) -> (i32, i32, i32) {
    %c0_i32 = arith.constant 0 : i32
    %c0_i32_0 = arith.constant 0 : i32
    return %arg0, %arg1, %c0_i32 : i32, i32, i32
  }
  func.func @transform_1(%arg0: i32, %arg1: i32) -> (i32, i32, i32) {
    %c0_i32 = arith.constant 0 : i32
    %c0_i32_0 = arith.constant 0 : i32
    return %arg0, %arg1, %c0_i32 : i32, i32, i32
  }
  func.func @transform_2(%arg0: i32, %arg1: i32) -> (i32, i32, i32) {
    %c0_i32 = arith.constant 0 : i32
    %c0_i32_0 = arith.constant 0 : i32
    return %arg0, %arg1, %c0_i32 : i32, i32, i32
  }
  func.func @transform_3(%arg0: i32, %arg1: i32) -> (i32, i32, i32) {
    %c0_i32 = arith.constant 0 : i32
    %c0_i32_0 = arith.constant 0 : i32
    return %arg0, %arg1, %c0_i32 : i32, i32, i32
  }
  func.func @transform_4(%arg0: i32, %arg1: i32) -> i32 {
    %c0_i32 = arith.constant 0 : i32
    %c0_i32_0 = arith.constant 0 : i32
    return %c0_i32 : i32
  }
  func.func @transform_5(%arg0: i32, %arg1: i32) -> i32 {
    %c0_i32 = arith.constant 0 : i32
    %c0_i32_0 = arith.constant 0 : i32
    return %c0_i32 : i32
  }
  func.func @transform_6(%arg0: i32, %arg1: i32) -> i32 {
    %c0_i32 = arith.constant 0 : i32
    %c0_i32_0 = arith.constant 0 : i32
    return %c0_i32 : i32
  }
  func.func @transform_7(%arg0: i32, %arg1: i32) -> (i32, i32, i32) {
    %c0_i32 = arith.constant 0 : i32
    %c0_i32_0 = arith.constant 0 : i32
    return %arg0, %arg1, %c0_i32 : i32, i32, i32
  }
}

</mosaic_0001>

<bundles_post_ra>
// kernel: tpu_custom_call.1
= control target key start
LH: loop header
LB: loop body
LE: loop exit
PB: predicated region body
PF: predicated region fallthrough
CT: control target
= control target key end

     0   :  { %s2045_s0 = inlined_call_operand.vmem [shape: f32[2,16,1], index: 0, kind: input, shape index: {}]   ;;  %s2046_s1 = inlined_call_operand.vmem [shape: f32[2,16,1], index: 1, kind: input, shape index: {}]   ;;  %s2047_s2 = inlined_call_operand.vmem [shape: f32[2,16,1], index: 2, kind: input, shape index: {}]   ;;  %s2048_s3 = inlined_call_operand.vmem [shape: f32[2,16,128], index: 3, kind: input, shape index: {}]   ;;  %s2049_s4 = inlined_call_operand.vmem [shape: f32[9], index: 4, kind: input, shape index: {}]   ;;  %s2050_s5 = inlined_call_operand.vmem [shape: f32[9], index: 5, kind: input, shape index: {}]   ;;  %s2051_s6 = inlined_call_operand.<no memory space> [shape: f32[1], index: 6, kind: input, shape index: {}]   ;;  %s2052_s7 = inlined_call_operand.hbm [shape: f32[2,16,128], index: 7, kind: output, shape index: {}]  }
   0x1   :  { %12 = sst [smem:[#allocation2]] %s2051_s6 }
   0x2   :  { %13 = vsyncpa [#allocation5], 0 }
   0x3   :  { %14 = vsyncpa [#allocation7], 0 }
   0x4   :  { %15 = vsyncpa [#allocation4], 0 }
   0x5   :  { %17 = vsyncpa [#allocation4 + $0x1], 0  ;;  %s1647_s26 = smov 0   ;;  %s1649_s27 = smov 0  }
   0x6   :  { %s1651_s28 = smov 0   ;;  %s1653_s29 = smov 0  }
   0x7   :  { %s1655_s30 = smov 0   ;;  %s1657_s8 = smov 0  }
   0x8 LB: > { %s1307_s6 = sadd.s32 4294967295, %s1590_s8   ;;  %s1308_s9 = sadd.s32 4294967294, %s1590_s8   ;;  %s1590_s8 = sphi %s1657_s8, %s23_s8   ;;  %s1586_s30 = sphi %s1655_s30, %s2070_s30   ;;  %s1582_s29 = sphi %s1653_s29, %s2069_s29   ;;  %s1578_s28 = sphi %s1651_s28, %s2068_s28   ;;  %s1574_s27 = sphi %s1649_s27, %s2067_s27   ;;  %s1570_s26 = sphi %s1647_s26, %s2066_s26  }
   0x9   : > { %s35_s10 = sadd.s32 1, %s1586_s30  ;;  %s219_s11 = sadd.s32 1, %s1578_s28 }
   0xa   : > { %p37_p0 = scmp.ge.s32.totalorder %s35_s10, 2  ;;  %p229_p1 = scmp.ne.s32.totalorder %s1578_s28, %s1574_s27 }
   0xb   : > { %p230_p2 = scmp.eq.s32.totalorder %s1307_s6, 1  ;;  %p235_p3 = scmp.ne.s32.totalorder %s1574_s27, %s1570_s26 }
   0xc   : > { %s2072_s10 = smov (%p37_p0, %s35_s10), 0  ;;  %p236_p5 = scmp.eq.s32.totalorder %s1308_s9, 1 }
   0xd   : > { %p1687_p4 = por %p230_p2, %p229_p1  ;;  %s214_s13 = ssub.s32 %s1586_s30, %s2072_s10 }
   0xe   : > { %p1309_p6 = scmp.ge.s32.totalorder %s1590_s8, 1  ;;  %p217_p7 = scmp.eq.s32.totalorder %s214_s13, 0 }
   0xf   : > { %s2057_s12 = scalar_select %p1687_p4, 1, 0 }
  0x10   : > { %p1694_p8 = por %p236_p5, %p235_p3  ;;  %p243_p9 = scmp.lt.s32.totalorder %s1590_s8, 3 }
  0x11   : > { %s1700_s15 = scalar_select %p217_p7, %s1578_s28, %s219_s11  }
  0x12   : > { %s2058_s14 = scalar_select %p1694_p8, 1, 0 }
  0x13   : > { %p1702_p10 = pnand %p1309_p6, %p243_p9  ;;  %p1706_p11 = scmp.eq.s32.totalorder %s1307_s6, 0 }
  0x14   : > { %s256_s20 = sshll.u32 %s2049_s4, 4  ;;  %s267_s23 = sshll.u32 %s2050_s5, 4  ;;  %s257_s20 = int_to_ptr.vmem [resolvable:$true] %s256_s20  ;;  %s268_s23 = int_to_ptr.vmem [resolvable:$true] %s267_s23 }
  0x15   : > { %s2059_s16 = scalar_select %p1702_p10, 1, 0 }
  0x16   : > { %s2060_s17 = scalar_select %p1706_p11, 1, 0 }
  0x17   : > { %p1385_p12 = pneg %p1702_p10  ;;  %s1474_s25 = scalar_lea.vmem %s257_s20, 16 }
  0x18   : > { %p1475_p0 = scmp.ne.s32.totalorder %s257_s20, %s1474_s25  ;;  %p1482_p5 = scmp.lt.s32.totalorder %s257_s20, %s257_s20 }
  0x19   : > { %p1720_p13 = pnand %p1706_p11, %p1385_p12  ;;  %p1483_p6 = scmp.lt.s32.totalorder %s1474_s25, %s1474_s25 }
  0x1b   : > { %p1476_p1 = pneg %p1720_p13  ;;  %p1484_p7 = por %p1483_p6, %p1482_p5 }
  0x1d   : > { %p1477_p2 = pnand %p1476_p1, %p1475_p0 }
  0x1f   : > { %p1478_p3 = pneg %p1477_p2 }
  0x21   : > { %p1485_p9 = pnand %p1484_p7, %p1478_p3 }
  0x23   : > { %1488 = shalt.err (!%p1485_p9)
}
  0x24   : > { %s1592_s6 = smov [#allocation3]   ;;  %s1489_s9 = scalar_lea.vmem %s268_s23, 16 }
  0x25   : > { %1388 = dma.vmem_to_smem (!%p1720_p13), %s257_s20, 16, %s1592_s6, [#allocation5]  }
  0x26   : > { %p1490_p12 = scmp.ne.s32.totalorder %s268_s23, %s1489_s9  ;;  %p1497_p11 = scmp.lt.s32.totalorder %s268_s23, %s268_s23 }
  0x27   : > { %p1498_p10 = scmp.lt.s32.totalorder %s1489_s9, %s1489_s9 }
  0x28   : > { %p1492_p8 = pnand %p1490_p12, %p1476_p1 }
  0x29   : > { %p1499_p0 = por %p1498_p10, %p1497_p11 }
  0x2a   : > { %p1493_p4 = pneg %p1492_p8 }
  0x2c   : > { %p1500_p2 = pnand %p1499_p0, %p1493_p4 }
  0x2e   : > { %1503 = shalt.err (!%p1500_p2)
}
  0x2f   : > { %s1593_s11 = smov [#allocation6]   ;;  %p2062_p3 = scmp.ne.s32.totalorder %s2059_s16, 0 }
  0x30   : > { %1391 = dma.vmem_to_smem (!%p1720_p13), %s268_s23, 16, %s1593_s11, [#allocation7]  }
  0x31   : > { %335 = sbr.rel (%p2062_p3) target bundleno = 367 (0x16f), region = 48  ;;  %p2063_p5 = scmp.ne.s32.totalorder (!%p2062_p3), %s2060_s17, 0 }
  0x38   : > { %1557 = dma.done.wait (%p2063_p5), [#allocation5], 16  }
  0x39   : > { %1559 = vsyncadd (%p2063_p5), [#allocation5], 4294967280 }
  0x3a   : > { %1561 = dma.done.wait (%p2063_p5), [#allocation7], 16  }
  0x3b   : > { %1563 = vsyncadd (%p2063_p5), [#allocation7], 4294967280 }
  0x3c   : > { %345 = sfence }
  0x3d   : > { %p404_p4 = scmp.lt.s32.totalorder %s1582_s29, 1  ;;  %v1594_v0 = vmov 0   ;;  %v450_v15 = vlaneseq  ;;  %v1595_v43 = vmov 683565275   ;;  %v1596_v47 = vmov 2475754826  }
  0x3e   : > { %1461 = vset.pattern.permute.xlu1 %v1594_v0  ;;  %1460 = vset.pattern.permute.xlu0 %v1594_v0  ;;  %v1597_v49 = vmov 2131351028   ;;  %v1598_v51 = vmov 2102212464   ;;  %v1599_v53 = vmov 920167782  }
  0x3f   : > { %s405_s13 = scalar_select %p404_p4, %s1582_s29, 1  ;;  %v451_v16 = vand.u32 127, %v450_v15  ;;  %v1600_v60 = vmov 1326507024  }
  0x40   : > { %s1810_s6 = sld [smem:[#allocation3]]  ;;  %s1815_s11 = sld [smem:[#allocation3 + $0x1]] }
  0x41   : > { %s1742_s16 = sshll.u32 %s405_s13, 4  ;;  %v452_v17 = vadd.s32 1, %v451_v16  ;;  %s1812_s9 = sld [smem:[#allocation6]] }
  0x42   : > { %s421_s20 = scalar_lea.vmem %s2046_s1, %s1742_s16  ;;  %s411_s22 = scalar_lea.vmem %s2045_s0, %s1742_s16 }
  0x43   : > { %v446_v1 = vld [vmem:[%s421_s20] sm:$0xff]  ;;  %s431_s25 = scalar_lea.vmem %s2047_s2, %s1742_s16  ;;  %v447_v5 = vld [vmem:[%s421_s20 + $0x8] sm:$0xff]  ;;  %v453_v18 = vcvt.s32.f32 %v452_v17  ;;  %s1819_s13 = sld [smem:[#allocation6 + $0x1]] }
  0x44   : > { %v444_v2 = vld [vmem:[%s411_s22] sm:$0xff]  ;;  %468 = vperm.xlu1 %1461, %v446_v1   ;;  %v449_v3 = vld [vmem:[%s431_s25 + $0x8] sm:$0xff]  ;;  %s1824_s18 = sld [smem:[#allocation3 + $0x2]]  ;;  %s1828_s20 = sld [smem:[#allocation3 + $0x3]] }
  0x45   : > { %456 = vperm.xlu0 %1460, %v444_v2   ;;  %v448_v4 = vld [vmem:[%s431_s25] sm:$0xff]  ;;  %v445_v6 = vld [vmem:[%s411_s22 + $0x8] sm:$0xff]  ;;  %v1095_v7 = vsub.f32 1.0, %v449_v3  ;;  %v1093_v9 = vmul.f32 0.003, %v449_v3  ;;  %s1826_s19 = sld [smem:[#allocation6 + $0x2]] }
  0x46   : > { %v1094_v8 = vsub.f32 1.0, %v448_v4  ;;  %v1092_v11 = vmul.f32 0.003, %v448_v4  ;;  %s1858_s21 = sld [smem:[#allocation6 + $0x3]]  ;;  %s1879_s17 = sld [smem:[#allocation3 + $0x4]] }
  0x47   : > { %v1097_v10 = vmul.f32 0.033333335, %v1095_v7  ;;  %s1883_s22 = sld [smem:[#allocation6 + $0x4]]  ;;  %s1911_s23 = sld [smem:[#allocation3 + $0x5]] }
  0x48   : > { %473 = vperm.xlu1 %1461, %v447_v5   ;;  %v1096_v12 = vmul.f32 0.033333335, %v1094_v8  ;;  %s1918_s24 = sld [smem:[#allocation6 + $0x5]]  ;;  %s1931_s25 = sld [smem:[#allocation3 + $0x6]] }
  0x49   : > { %461 = vperm.xlu0 %1460, %v445_v6   ;;  %v1099_v13 = vadd.f32 %v1097_v10, %v1093_v9  ;;  %p2064_p10 = scmp.ne.s32.totalorder %s2057_s12, 0 }
  0x4a   : > { %v1098_v14 = vadd.f32 %v1096_v12, %v1092_v11 }
  0x4c   : > { %1107 = vperm.xlu1 %1461, %v449_v3  }
  0x4d   : > { %1102 = vperm.xlu0 %1460, %v448_v4  }
  0x50   : > { %1121 = vperm.xlu1 %1461, %v1099_v13  }
  0x51   : > { %1116 = vperm.xlu0 %1460, %v1098_v14  }
  0xc3   : > { %v469_v20 = vpop.permute.xlu1 %468 }
  0xc4   : > { %v457_v19 = vpop.permute.xlu0 %456 }
  0xc5   : > { %v464_v21 = vmul.f32 %v457_v19, %v453_v18 }
  0xc7   : > { %v1756_v22 = vadd.f32 %v469_v20, %v464_v21  ;;  %v474_v28 = vpop.permute.xlu1 %473 }
  0xc8   : > { %v462_v23 = vpop.permute.xlu0 %461 }
  0xc9   : > { %v478_v24 = vand.u32 2147483647, %v1756_v22  ;;  %v481_v25 = vand.u32 2139095040, %v1756_v22  ;;  %v465_v26 = vmul.f32 %v462_v23, %v453_v18  ;;  %vm480_vm14 = vcmp.lt.s32.totalorder %v1756_v22, 0 }
  0xcb   : > { %v482_v27 = vshrl.u32 %v481_v25, 23  ;;  %v485_v29 = vand.u32 8388607, %v478_v24  ;;  %v1762_v30 = vadd.f32 %v474_v28, %v465_v26  ;;  %vm479_vm15 = vcmp.le.f32.partialorder %v478_v24, 0.7853982 }
  0xcd   : > { %v1325_v31 = vadd.s32 4294967169, %v482_v27  ;;  %v585_v32 = vand.u32 2139095040, %v1762_v30  ;;  %v486_v34 = vor.u32 8388608, %v485_v29  ;;  %v582_v36 = vand.u32 2147483647, %v1762_v30 }
  0xcf   : > { %v488_v33 = vadd.s32 1, %v1325_v31  ;;  %v586_v35 = vshrl.u32 %v585_v32, 23  ;;  %v1766_v41 = vshll.u32 %v486_v34, 8  ;;  %v589_v45 = vand.u32 8388607, %v582_v36 }
  0xd1   : > { %vm489_vm0 = vcmp.gt.s32.totalorder %v488_v33, 0  ;;  %v1329_v38 = vadd.s32 4294967169, %v586_v35  ;;  %v590_v11 = vor.u32 8388608, %v589_v45 }
  0xd2   : > { %v490_v37 = vsel %vm489_vm0, %v488_v33, 0  ;;  %vm584_vm0 = vcmp.lt.s32.totalorder %v1762_v30, 0 }
  0xd3   : > { %v491_v39 = vshrl.u32 %v490_v37, 5  ;;  %v492_v40 = vand.u32 31, %v490_v37  ;;  %v592_v46 = vadd.s32 1, %v1329_v38  ;;  %v630_v26 = vshll.u32 %v590_v11, 8 }
  0xd5   : > { %v493_v42 = vsub.s32 32, %v492_v40  ;;  %v495_v44 = vshll.u32 %v1595_v43, %v492_v40  ;;  %v498_v48 = vshll.u32 %v1596_v47, %v492_v40  ;;  %v501_v50 = vshll.u32 %v1597_v49, %v492_v40 }
  0xd6   : > { %v504_v52 = vshll.u32 %v1598_v51, %v492_v40  ;;  %v507_v54 = vshll.u32 %v1599_v53, %v492_v40  ;;  %vm510_vm1 = vcmp.lt.s32.totalorder %v491_v39, 1  ;;  %vm512_vm2 = vcmp.lt.s32.totalorder %v491_v39, 3 }
  0xd7   : > { %v496_v55 = vshrl.u32 %v1596_v47, %v493_v42  ;;  %v499_v56 = vshrl.u32 %v1597_v49, %v493_v42  ;;  %v502_v57 = vshrl.u32 %v1598_v51, %v493_v42  ;;  %v494_v58 = vshrl.u32 %v1595_v43, %v493_v42 }
  0xd8   : > { %v505_v59 = vshrl.u32 %v1599_v53, %v493_v42  ;;  %v508_v61 = vshrl.u32 %v1600_v60, %v493_v42  ;;  %vm593_vm3 = vcmp.gt.s32.totalorder %v592_v46, 0  ;;  %vm513_vm4 = vcmp.lt.s32.totalorder %v491_v39, 4 }
  0xd9   : > { %v497_v62 = vor.u32 %v496_v55, %v495_v44  ;;  %v500_v63 = vor.u32 %v499_v56, %v498_v48  ;;  %v503_v0 = vor.u32 %v502_v57, %v501_v50  ;;  %v594_v3 = vsel %vm593_vm3, %v592_v46, 0 }
  0xda   : > { %v506_v1 = vor.u32 %v505_v59, %v504_v52  ;;  %v509_v2 = vor.u32 %v508_v61, %v507_v54  ;;  %vm511_vm5 = vcmp.lt.s32.totalorder %v491_v39, 2  ;;  %v596_v14 = vand.u32 31, %v594_v3 }
  0xdb   : > { %v514_v4 = vsel %vm510_vm1, %v494_v58, %v497_v62  ;;  %v515_v5 = vsel %vm513_vm4, %v503_v0, 2102212464  ;;  %v518_v6 = vsel %vm510_vm1, %v497_v62, %v500_v63  ;;  %v522_v7 = vsel %vm510_vm1, %v500_v63, %v503_v0 }
  0xdc   : > { %v516_v8 = vsel %vm512_vm2, %v500_v63, %v515_v5  ;;  %v519_v9 = vsel %vm513_vm4, %v506_v1, 920167782  ;;  %v523_v10 = vsel %vm513_vm4, %v509_v2, 1326507024  ;;  %v595_v23 = vshrl.u32 %v594_v3, 5 }
  0xdd   : > { %v520_v12 = vsel %vm512_vm2, %v503_v0, %v519_v9  ;;  %v524_v13 = vsel %vm512_vm2, %v506_v1, %v523_v10  ;;  %v517_v15 = vsel %vm511_vm5, %v514_v4, %v516_v8  ;;  %v597_v25 = vsub.s32 32, %v596_v14 }
  0xde   : > { %v521_v16 = vsel %vm511_vm5, %v518_v6, %v520_v12  ;;  %v525_v17 = vsel %vm511_vm5, %v522_v7, %v524_v13  ;;  %v533_v27 = vmul.u32 %v1766_v41, %v517_v15  ;;  %v599_v28 = vshll.u32 %v1595_v43, %v596_v14 }
  0xdf   : > { %v1779_v18 = vmul.u32.u64.low %v1766_v41, %v525_v17  ;;  %v1780_v19 = vmul.u32.u64.high %v1766_v41, %v525_v17, %v1779_v18  ;;  %v1783_v20 = vmul.u32.u64.low %v1766_v41, %v521_v16  ;;  %v1784_v21 = vmul.u32.u64.high %v1766_v41, %v521_v16, %v1783_v20 }
  0xe0   : > { %v602_v29 = vshll.u32 %v1596_v47, %v596_v14  ;;  %v605_v31 = vshll.u32 %v1597_v49, %v596_v14  ;;  %v600_v32 = vshrl.u32 %v1596_v47, %v597_v25  ;;  %v603_v33 = vshrl.u32 %v1597_v49, %v597_v25 }
  0xe1   : > { %v606_v34 = vshrl.u32 %v1598_v51, %v597_v25  ;;  %v608_v35 = vshll.u32 %v1598_v51, %v596_v14  ;;  %vm535_vm6 = vc.u32 %v1780_v19, %v1783_v20  ;;  %v536_v37 = vadd.s32 1, %v1784_v21 }
  0xe2   : > { %v609_v38 = vshrl.u32 %v1599_v53, %v597_v25  ;;  %v611_v39 = vshll.u32 %v1599_v53, %v596_v14  ;;  %v601_v40 = vor.u32 %v600_v32, %v599_v28  ;;  %v604_v42 = vor.u32 %v603_v33, %v602_v29 }
  0xe3   : > { %v607_v44 = vor.u32 %v606_v34, %v605_v31  ;;  %v612_v45 = vshrl.u32 %v1600_v60, %v597_v25  ;;  %v537_v41 = vsel %vm535_vm6, %v536_v37, %v1784_v21  ;;  %vm614_vm7 = vcmp.lt.s32.totalorder %v595_v23, 1 }
  0xe4   : > { %v610_v46 = vor.u32 %v609_v38, %v608_v35  ;;  %vm617_vm8 = vcmp.lt.s32.totalorder %v595_v23, 4  ;;  %v538_v47 = vadd.s32 %v537_v41, %v533_v27  ;;  %vm616_vm9 = vcmp.lt.s32.totalorder %v595_v23, 3 }
  0xe5   : > { %v613_v48 = vor.u32 %v612_v45, %v611_v39  ;;  %v619_v49 = vsel %vm617_vm8, %v607_v44, 2102212464  ;;  %v598_v50 = vshrl.u32 %v1595_v43, %v597_v25  ;;  %v622_v51 = vsel %vm614_vm7, %v601_v40, %v604_v42 }
  0xe6   : > { %v623_v52 = vsel %vm617_vm8, %v610_v46, 920167782  ;;  %v626_v54 = vsel %vm614_vm7, %v604_v42, %v607_v44  ;;  %v539_v55 = vadd.s32 536870912, %v538_v47  ;;  %vm615_vm10 = vcmp.lt.s32.totalorder %v595_v23, 2 }
  0xe7   : > { %v624_v53 = vsel %vm616_vm9, %v607_v44, %v623_v52  ;;  %v627_v56 = vsel %vm617_vm8, %v613_v48, 1326507024  ;;  %v618_v57 = vsel %vm614_vm7, %v598_v50, %v601_v40  ;;  %v620_v58 = vsel %vm616_vm9, %v604_v42, %v619_v49 }
  0xe8   : > { %v625_v59 = vsel %vm615_vm10, %v622_v51, %v624_v53  ;;  %v628_v60 = vsel %vm616_vm9, %v610_v46, %v627_v56  ;;  %v540_v61 = vshrl.u32 %v539_v55, 30  ;;  %v621_v3 = vsel %vm615_vm10, %v618_v57, %v620_v58 }
  0xe9   : > { %v629_v62 = vsel %vm615_vm10, %v626_v54, %v628_v60  ;;  %v1794_v63 = vmul.u32.u64.low %v630_v26, %v625_v59  ;;  %v1795_v0 = vmul.u32.u64.high %v630_v26, %v625_v59, %v1794_v63  ;;  %v637_v6 = vmul.u32 %v630_v26, %v621_v3 }
  0xea   : > { %v1797_v1 = vmul.u32.u64.low %v630_v26, %v629_v62  ;;  %v1798_v2 = vmul.u32.u64.high %v630_v26, %v629_v62, %v1797_v1  ;;  %v541_v43 = vshll.u32 %v540_v61, 30  ;;  %v534_v18 = vadd.s32 %v1783_v20, %v1780_v19 }
  0xeb   : > { %v640_v5 = vadd.s32 1, %v1795_v0  ;;  %v564_v40 = vsub.s32 4, %v540_v61  ;;  %vm583_vm1 = vcmp.le.f32.partialorder %v582_v36, 0.7853982  ;;  %vm570_vm8 = vweird.f32 %v1756_v22 }
  0xec   : > { %v542_v4 = vsub.s32 %v538_v47, %v541_v43  ;;  %vm639_vm11 = vc.u32 %v1798_v2, %v1794_v63  ;;  %v638_v19 = vadd.s32 %v1794_v63, %v1798_v2  ;;  %v893_v2 = vstv %s1810_s6  ;;  %s1940_s6 = sld [smem:[#allocation6 + $0x6]] }
  0xed   : > { %v641_v8 = vsel %vm639_vm11, %v640_v5, %v1795_v0  ;;  %v565_v49 = vsel %vm480_vm14, %v564_v40, %v540_v61  ;;  %v897_v43 = vstv %s1812_s9  ;;  %vm674_vm9 = vweird.f32 %v1762_v30  ;;  %s1944_s9 = sld [smem:[#allocation3 + $0x7]] }
  0xee   : > { %v544_v7 = vsub.s32 0, %v542_v4  ;;  %v642_v9 = vadd.s32 %v641_v8, %v637_v6  ;;  %v567_v54 = vsel %vm479_vm15, 0, %v565_v49 }
  0xef   : > { %v571_v57 = vadd.s32 3, %v567_v54  ;;  %v779_v59 = vand.u32 3, %v567_v54 }
  0xf0   : > { %v1326_v10 = vmin.u32 %v544_v7, %v542_v4  ;;  %v643_v11 = vadd.s32 536870912, %v642_v9 }
  0xf1   : > { %v572_v61 = vand.u32 3, %v571_v57  ;;  %vm780_vm2 = vcmp.lt.s32.totalorder %v779_v59, 2  ;;  %vm784_vm4 = vcmp.eq.s32.totalorder %v779_v59, 2  ;;  %vm781_vm6 = vcmp.eq.s32.totalorder %v779_v59, 0 }
  0xf2   : > { %v546_v12 = vclz %v1326_v10  ;;  %v644_v13 = vshrl.u32 %v643_v11, 30 }
  0xf3   : > { %vm577_vm3 = vcmp.eq.s32.totalorder %v572_v61, 2  ;;  %vm574_vm5 = vcmp.eq.s32.totalorder %v572_v61, 0  ;;  %vm573_vm7 = vcmp.lt.s32.totalorder %v572_v61, 2 }
  0xf4   : > { %v1327_v14 = vadd.s32 4294967294, %v546_v12  ;;  %v645_v15 = vshll.u32 %v644_v13, 30  ;;  %v668_v24 = vsub.s32 4, %v644_v13 }
  0xf6   : > { %vm1328_vm12 = vcmp.lt.s32.totalorder %v1327_v14, 0  ;;  %v646_v17 = vsub.s32 %v642_v9, %v645_v15  ;;  %v669_v62 = vsel %vm584_vm0, %v668_v24, %v644_v13 }
  0xf7   : > { %v549_v16 = vsel %vm1328_vm12, 0, %v1327_v14  ;;  %v671_v5 = vsel %vm583_vm1, 0, %v669_v62 }
  0xf8   : > { %v550_v21 = vsub.s32 32, %v549_v16  ;;  %v554_v23 = vsub.s32 4294967266, %v549_v16  ;;  %v648_v25 = vsub.s32 0, %v646_v17  ;;  %v551_v26 = vshll.u32 %v542_v4, %v549_v16 }
  0xf9   : > { %v675_v10 = vadd.s32 3, %v671_v5  ;;  %v882_v15 = vand.u32 3, %v671_v5  ;;  %v913_v16 = vstv %s1815_s11  ;;  %s1955_s11 = sld [smem:[#allocation6 + $0x7]] }
  0xfa   : > { %v552_v27 = vshrl.u32 %v534_v18, %v550_v21  ;;  %v555_v28 = vadd.s32 127, %v554_v23  ;;  %v1330_v29 = vmin.u32 %v648_v25, %v646_v17  ;;  %v919_v25 = vstv %s1819_s13  ;;  %s1965_s13 = sld [smem:[#allocation3 + $0x8]] }
  0xfb   : > { %v676_v23 = vand.u32 3, %v675_v10  ;;  %vm883_vm10 = vcmp.lt.s32.totalorder %v882_v15, 2  ;;  %vm884_vm11 = vcmp.eq.s32.totalorder %v882_v15, 0  ;;  %vm887_vm12 = vcmp.eq.s32.totalorder %v882_v15, 2 }
  0xfc   : > { %v553_v31 = vor.u32 %v552_v27, %v551_v26  ;;  %v556_v32 = vshll.u32 %v555_v28, 23  ;;  %v650_v33 = vclz %v1330_v29  ;;  %v937_v26 = vstv %s1824_s18  ;;  %s1972_s18 = sld [smem:[#allocation6 + $0x8]] }
  0xfd   : > { %v943_v28 = vstv %s1826_s19  ;;  %v961_v29 = vstv %s1828_s20 }
  0xfe   : > { %v557_v34 = vor.u32 4788187, %v556_v32  ;;  %v1331_v35 = vadd.s32 4294967294, %v650_v33  ;;  %v560_v38 = vcvt.s32.f32 %v553_v31 }
 0x100   : > { %v558_v37 = vand.u32 2147483647, %v557_v34  ;;  %vm1332_vm13 = vcmp.lt.s32.totalorder %v1331_v35, 0 }
 0x101   : > { %v653_v42 = vsel %vm1332_vm13, 0, %v1331_v35  ;;  %vm678_vm13 = vcmp.eq.s32.totalorder %v676_v23, 0 }
 0x102   : > { %v561_v39 = vmul.f32 %v560_v38, %v558_v37  ;;  %v654_v20 = vsub.s32 32, %v653_v42  ;;  %v658_v44 = vsub.s32 4294967266, %v653_v42  ;;  %v655_v41 = vshll.u32 %v646_v17, %v653_v42 }
 0x104   : > { %v562_v45 = vxor.u32 2147483648, %v561_v39  ;;  %v656_v46 = vshrl.u32 %v638_v19, %v654_v20  ;;  %v659_v47 = vadd.s32 127, %v658_v44 }
 0x106   : > { %v563_v48 = vsel %vm480_vm14, %v562_v45, %v561_v39  ;;  %v657_v51 = vor.u32 %v656_v46, %v655_v41  ;;  %v660_v52 = vshll.u32 %v659_v47, 23  ;;  %vm681_vm14 = vcmp.eq.s32.totalorder %v676_v23, 2 }
 0x107   : > { %v566_v50 = vsel %vm479_vm15, %v1756_v22, %v563_v48  ;;  %vm677_vm15 = vcmp.lt.s32.totalorder %v676_v23, 2 }
 0x108   : > { %1462 = vcosq.f32 %v566_v50  ;;  %v661_v55 = vor.u32 4788187, %v660_v52  ;;  %v664_v56 = vcvt.s32.f32 %v657_v51 }
 0x109   : > { %1464 = vsinq.f32 %v566_v50 }
 0x10a   : > { %v662_v53 = vand.u32 2147483647, %v661_v55 }
 0x10c   : > { %v665_v58 = vmul.f32 %v664_v56, %v662_v53 }
 0x10e   : > { %v666_v60 = vxor.u32 2147483648, %v665_v58 }
 0x110   : > { %v667_v63 = vsel %vm584_vm0, %v666_v60, %v665_v58 }
 0x111   : > { %v670_v1 = vsel %vm583_vm1, %v1762_v30, %v667_v63 }
 0x112   : > { %v1463_v0 = vpop.eup %1462  ;;  %1466 = vcosq.f32 %v670_v1 }
 0x113   : > { %v1465_v3 = vpop.eup %1464  ;;  %v578_v4 = vxor.u32 2147483648, %v1463_v0  ;;  %1468 = vsinq.f32 %v670_v1 }
 0x114   : > { %v575_v36 = vxor.u32 2147483648, %v1465_v3 }
 0x115   : > { %v579_v6 = vsel %vm577_vm3, %v578_v4, %v1465_v3  ;;  %v786_v7 = vsel %vm784_vm4, %v578_v4, %v1465_v3  ;;  %v967_v3 = vstv %s1858_s21  ;;  %s441_s21 = scalar_lea.vmem %s2048_s3, %s1742_s16  ;;  %s400_s16 = sand.u32 1, %s1574_s27  }
 0x116   : > { %v576_v8 = vsel %vm574_vm5, %v1463_v0, %v575_v36  ;;  %v783_v9 = vsel %vm781_vm6, %v1463_v0, %v575_v36 }
 0x117   : > { %v580_v11 = vsel %vm573_vm7, %v576_v8, %v579_v6  ;;  %v787_v12 = vsel %vm780_vm2, %v783_v9, %v786_v7 }
 0x118   : > { %v1832_v13 = vsel %vm570_vm8, nan, %v580_v11  ;;  %v1834_v14 = vsel %vm570_vm8, nan, %v787_v12 }
 0x119   : > { %v894_v17 = vmul.f32 %v893_v2, %v1832_v13  ;;  %v898_v18 = vmul.f32 %v897_v43, %v1834_v14  ;;  %v902_v22 = vmul.f32 %v1834_v14, %v1832_v13  ;;  %v906_v21 = vmul.f32 %v1834_v14, %v1834_v14 }
 0x11a   : > { %v908_v27 = vmul.f32 %v1832_v13, %v1832_v13 }
 0x11b   : > { %v904_v31 = vadd.f32 %v902_v22, %v902_v22  ;;  %v900_v34 = vadd.f32 %v898_v18, %v894_v17 }
 0x11c   : > { %v910_v32 = vsub.f32 %v906_v21, %v908_v27  ;;  %v1467_v33 = vpop.eup %1466  ;;  %v985_v27 = vstv %s1879_s17  ;;  %s1128_s17 = sld [smem:[#allocation2]] }
 0x11d   : > { %v914_v35 = vmul.f32 %v913_v16, %v904_v31  ;;  %v924_v37 = vmul.f32 %v904_v31, %v1834_v14  ;;  %v932_v38 = vmul.f32 %v904_v31, %v1832_v13  ;;  %v1469_v39 = vpop.eup %1468  ;;  %v682_v40 = vxor.u32 2147483648, %v1467_v33 }
 0x11e   : > { %v926_v42 = vmul.f32 %v910_v32, %v1832_v13  ;;  %v930_v19 = vmul.f32 %v910_v32, %v1834_v14  ;;  %v679_v20 = vxor.u32 2147483648, %v1469_v39  ;;  %v920_v45 = vmul.f32 %v919_v25, %v910_v32 }
 0x11f   : > { %v916_v44 = vadd.f32 %v914_v35, %v900_v34  ;;  %v683_v41 = vsel %vm681_vm14, %v682_v40, %v1469_v39  ;;  %v889_v46 = vsel %vm887_vm12, %v682_v40, %v1469_v39 }
 0x120   : > { %v928_v47 = vadd.f32 %v926_v42, %v924_v37  ;;  %v934_v48 = vsub.f32 %v930_v19, %v932_v38  ;;  %v680_v49 = vsel %vm678_vm13, %v1467_v33, %v679_v20  ;;  %v886_v50 = vsel %vm884_vm11, %v1467_v33, %v679_v20 }
 0x121   : > { %v922_v51 = vadd.f32 %v920_v45, %v916_v44  ;;  %v684_v52 = vsel %vm677_vm15, %v680_v49, %v683_v41  ;;  %v890_v54 = vsel %vm883_vm10, %v886_v50, %v889_v46  ;;  %v991_v33 = vstv %s1883_s22  ;;  %s1316_s22 = sshll.u32 %s400_s16, 4 }
 0x122   : > { %v938_v55 = vmul.f32 %v937_v26, %v928_v47  ;;  %v944_v53 = vmul.f32 %v943_v28, %v934_v48  ;;  %v1873_v56 = vsel %vm674_vm9, nan, %v684_v52  ;;  %v1877_v57 = vsel %vm674_vm9, nan, %v890_v54 }
 0x123   : > { %v948_v24 = vmul.f32 %v928_v47, %v1834_v14  ;;  %v950_v58 = vmul.f32 %v934_v48, %v1832_v13  ;;  %v895_v59 = vmul.f32 %v893_v2, %v1873_v56  ;;  %v899_v60 = vmul.f32 %v897_v43, %v1877_v57 }
 0x124   : > { %v903_v30 = vmul.f32 %v1877_v57, %v1873_v56  ;;  %v907_v61 = vmul.f32 %v1877_v57, %v1877_v57  ;;  %v909_v62 = vmul.f32 %v1873_v56, %v1873_v56  ;;  %v940_v63 = vadd.f32 %v938_v55, %v922_v51 }
 0x125   : > { %v952_v0 = vadd.f32 %v950_v58, %v948_v24  ;;  %v954_v1 = vmul.f32 %v934_v48, %v1834_v14  ;;  %v901_v2 = vadd.f32 %v899_v60, %v895_v59  ;;  %v956_v5 = vmul.f32 %v928_v47, %v1832_v13 }
 0x126   : > { %v905_v4 = vadd.f32 %v903_v30, %v903_v30  ;;  %v911_v43 = vsub.f32 %v907_v61, %v909_v62  ;;  %v946_v36 = vadd.f32 %v944_v53, %v940_v63  ;;  %v1009_v53 = vstv %s1911_s23  ;;  %s1366_s23 = sshll.u32 %s1582_s29, 8  ;;  %s1601_s29 = smov [#allocation8]  }
 0x127   : > { %v962_v6 = vmul.f32 %v961_v29, %v952_v0  ;;  %v972_v7 = vmul.f32 %v952_v0, %v1834_v14  ;;  %v958_v11 = vsub.f32 %v954_v1, %v956_v5  ;;  %s1508_s19 = sshll.u32 %s1601_s29, 4  ;;  %s1509_s19 = int_to_ptr.vmem [resolvable:$false] %s1508_s19 }
 0x128   : > { %v915_v8 = vmul.f32 %v913_v16, %v905_v4  ;;  %v925_v9 = vmul.f32 %v905_v4, %v1877_v57  ;;  %v933_v10 = vmul.f32 %v905_v4, %v1873_v56  ;;  %v921_v12 = vmul.f32 %v919_v25, %v911_v43  ;;  %s1510_s20 = scalar_lea.vmem %s1509_s19, 512 }
 0x129   : > { %v927_v15 = vmul.f32 %v911_v43, %v1873_v56  ;;  %v931_v17 = vmul.f32 %v911_v43, %v1877_v57  ;;  %v964_v18 = vadd.f32 %v962_v6, %v946_v36  ;;  %v968_v21 = vmul.f32 %v967_v3, %v958_v11 }
 0x12a   : > { %v917_v22 = vadd.f32 %v915_v8, %v901_v2  ;;  %v974_v16 = vmul.f32 %v958_v11, %v1832_v13  ;;  %v978_v23 = vmul.f32 %v958_v11, %v1834_v14  ;;  %v980_v25 = vmul.f32 %v952_v0, %v1832_v13 }
 0x12b   : > { %v929_v31 = vadd.f32 %v927_v15, %v925_v9  ;;  %v935_v32 = vsub.f32 %v931_v17, %v933_v10  ;;  %v970_v35 = vadd.f32 %v968_v21, %v964_v18  ;;  %v1033_v17 = vstv %s1931_s25 }
 0x12c   : > { %v923_v34 = vadd.f32 %v921_v12, %v917_v22  ;;  %v976_v37 = vadd.f32 %v974_v16, %v972_v7  ;;  %v982_v44 = vsub.f32 %v978_v23, %v980_v25 }
 0x12d   : > { %v939_v38 = vmul.f32 %v937_v26, %v929_v31  ;;  %v945_v39 = vmul.f32 %v943_v28, %v935_v32  ;;  %v949_v40 = vmul.f32 %v929_v31, %v1877_v57  ;;  %v951_v42 = vmul.f32 %v935_v32, %v1873_v56 }
 0x12e   : > { %v955_v19 = vmul.f32 %v935_v32, %v1877_v57  ;;  %v957_v20 = vmul.f32 %v929_v31, %v1873_v56  ;;  %v986_v45 = vmul.f32 %v985_v27, %v976_v37  ;;  %v996_v47 = vmul.f32 %v976_v37, %v1834_v14 }
 0x12f   : > { %v941_v41 = vadd.f32 %v939_v38, %v923_v34  ;;  %v953_v46 = vadd.f32 %v951_v42, %v949_v40  ;;  %v1004_v26 = vmul.f32 %v976_v37, %v1832_v13  ;;  %v992_v49 = vmul.f32 %v991_v33, %v982_v44 }
 0x130   : > { %v959_v48 = vsub.f32 %v955_v19, %v957_v20  ;;  %v988_v28 = vadd.f32 %v986_v45, %v970_v35  ;;  %v998_v50 = vmul.f32 %v982_v44, %v1832_v13  ;;  %v1002_v62 = vmul.f32 %v982_v44, %v1834_v14 }
 0x131   : > { %v947_v51 = vadd.f32 %v945_v39, %v941_v41  ;;  %v963_v52 = vmul.f32 %v961_v29, %v953_v46  ;;  %v973_v54 = vmul.f32 %v953_v46, %v1877_v57  ;;  %v981_v55 = vmul.f32 %v953_v46, %v1873_v56 }
 0x132   : > { %v969_v24 = vmul.f32 %v967_v3, %v959_v48  ;;  %v975_v58 = vmul.f32 %v959_v48, %v1873_v56  ;;  %v979_v59 = vmul.f32 %v959_v48, %v1877_v57  ;;  %v994_v30 = vadd.f32 %v992_v49, %v988_v28 }
 0x133   : > { %v965_v60 = vadd.f32 %v963_v52, %v947_v51  ;;  %v1000_v61 = vadd.f32 %v998_v50, %v996_v47  ;;  %v1015_v29 = vstv %s1918_s24  ;;  %v1006_v2 = vsub.f32 %v1002_v62, %v1004_v26  ;;  %s402_s24 = scalar_lea.vmem [#allocation8], %s1316_s22 }
 0x134   : > { %v977_v63 = vadd.f32 %v975_v58, %v973_v54  ;;  %v983_v0 = vsub.f32 %v979_v59, %v981_v55  ;;  %v1039_v32 = vstv %s1940_s6  ;;  %v1057_v44 = vstv %s1944_s9  ;;  %s1152_s25 = sshll.u32 %s402_s24, 4  ;;  %s1997_s25 = int_to_ptr.vmem [resolvable:$true] %s1152_s25 }
 0x135   : > { %v971_v1 = vadd.f32 %v969_v24, %v965_v60  ;;  %v1010_v4 = vmul.f32 %v1009_v53, %v1000_v61  ;;  %v1020_v36 = vmul.f32 %v1000_v61, %v1834_v14  ;;  %v1022_v12 = vmul.f32 %v1006_v2, %v1832_v13  ;;  %p1511_p1 = scmp.lt.s32.totalorder %s1997_s25, %s1509_s19 }
 0x136   : > { %v987_v3 = vmul.f32 %v985_v27, %v977_v63  ;;  %v997_v5 = vmul.f32 %v977_v63, %v1877_v57  ;;  %v999_v43 = vmul.f32 %v983_v0, %v1873_v56  ;;  %v993_v6 = vmul.f32 %v991_v33, %v983_v0 }
 0x137   : > { %v1003_v7 = vmul.f32 %v983_v0, %v1877_v57  ;;  %v1005_v8 = vmul.f32 %v977_v63, %v1873_v56  ;;  %v1012_v9 = vadd.f32 %v1010_v4, %v994_v30  ;;  %v1026_v15 = vmul.f32 %v1006_v2, %v1834_v14 }
 0x138   : > { %v989_v10 = vadd.f32 %v987_v3, %v971_v1  ;;  %v1001_v11 = vadd.f32 %v999_v43, %v997_v5  ;;  %v1016_v22 = vmul.f32 %v1015_v29, %v1006_v2  ;;  %v1028_v21 = vmul.f32 %v1000_v61, %v1832_v13  ;;  %v1108_v3 = vpop.permute.xlu1 %1107 }
 0x139   : > { %v1007_v18 = vsub.f32 %v1003_v7, %v1005_v8  ;;  %v1024_v34 = vadd.f32 %v1022_v12, %v1020_v36  ;;  %v1063_v58 = vstv %s1955_s11  ;;  %v1103_v12 = vpop.permute.xlu0 %1102  ;;  %s1995_s11 = scalar_lea.hbm %s2052_s7, %s1366_s23 }
 0x13a   : > { %v995_v16 = vadd.f32 %v993_v6, %v989_v10  ;;  %v1011_v23 = vmul.f32 %v1009_v53, %v1001_v11  ;;  %v1021_v27 = vmul.f32 %v1001_v11, %v1877_v57  ;;  %v1029_v31 = vmul.f32 %v1001_v11, %v1873_v56 }
 0x13b   : > { %v1023_v25 = vmul.f32 %v1007_v18, %v1873_v56  ;;  %v1027_v33 = vmul.f32 %v1007_v18, %v1877_v57  ;;  %v1017_v37 = vmul.f32 %v1015_v29, %v1007_v18  ;;  %v1018_v38 = vadd.f32 %v1016_v22, %v1012_v9 }
 0x13c   : > { %v1013_v35 = vadd.f32 %v1011_v23, %v995_v16  ;;  %v1030_v39 = vsub.f32 %v1026_v15, %v1028_v21  ;;  %v1034_v19 = vmul.f32 %v1033_v17, %v1024_v34  ;;  %v1044_v20 = vmul.f32 %v1024_v34, %v1834_v14 }
 0x13d   : > { %v1025_v40 = vadd.f32 %v1023_v25, %v1021_v27  ;;  %v1031_v42 = vsub.f32 %v1027_v33, %v1029_v31  ;;  %v1052_v24 = vmul.f32 %v1024_v34, %v1832_v13  ;;  %v1081_v11 = vstv %s1965_s13  ;;  %v1113_v31 = vld [vmem:[%s441_s21 + $0x8] sm:$0xff]  ;;  %v1112_v33 = vld [vmem:[%s441_s21] sm:$0xff]  ;;  %v1117_v34 = vpop.permute.xlu0 %1116  ;;  %s1999_s13 = scalar_lea.sflag [#allocation4], %s400_s16 }
 0x13e   : > { %v1019_v45 = vadd.f32 %v1017_v37, %v1013_v35  ;;  %v1040_v41 = vmul.f32 %v1039_v32, %v1030_v39  ;;  %v1046_v46 = vmul.f32 %v1030_v39, %v1832_v13  ;;  %v1050_v28 = vmul.f32 %v1030_v39, %v1834_v14 }
 0x13f   : > { %v1035_v47 = vmul.f32 %v1033_v17, %v1025_v40  ;;  %v1045_v26 = vmul.f32 %v1025_v40, %v1877_v57  ;;  %v1047_v48 = vmul.f32 %v1031_v42, %v1873_v56  ;;  %v1051_v49 = vmul.f32 %v1031_v42, %v1877_v57 }
 0x140   : > { %v1053_v50 = vmul.f32 %v1025_v40, %v1873_v56  ;;  %v1036_v51 = vadd.f32 %v1034_v19, %v1018_v38  ;;  %v1048_v52 = vadd.f32 %v1046_v46, %v1044_v20  ;;  %v1041_v55 = vmul.f32 %v1039_v32, %v1031_v42 }
 0x141   : > { %v1037_v54 = vadd.f32 %v1035_v47, %v1019_v45  ;;  %v1049_v53 = vadd.f32 %v1047_v48, %v1045_v26  ;;  %v1054_v2 = vsub.f32 %v1050_v28, %v1052_v24  ;;  %v1087_v22 = vstv %s1972_s18  ;;  %s1504_s18 = scalar_lea.vmem %s1997_s25, 256 }
 0x142   : > { %v1055_v59 = vsub.f32 %v1051_v49, %v1053_v50  ;;  %v1042_v60 = vadd.f32 %v1040_v41, %v1036_v51  ;;  %v1058_v30 = vmul.f32 %v1057_v44, %v1048_v52  ;;  %v1068_v4 = vmul.f32 %v1048_v52, %v1834_v14  ;;  %p1505_p8 = scmp.ne.s32.totalorder %s1997_s25, %s1504_s18  ;;  %p1512_p6 = scmp.lt.s32.totalorder %s1510_s20, %s1504_s18 }
 0x143   : > { %v1043_v61 = vadd.f32 %v1041_v55, %v1037_v54  ;;  %v1059_v62 = vmul.f32 %v1057_v44, %v1049_v53  ;;  %v1069_v63 = vmul.f32 %v1049_v53, %v1877_v57  ;;  %v1077_v0 = vmul.f32 %v1049_v53, %v1873_v56 }
 0x144   : > { %v1071_v29 = vmul.f32 %v1055_v59, %v1873_v56  ;;  %v1075_v1 = vmul.f32 %v1055_v59, %v1877_v57  ;;  %v1065_v43 = vmul.f32 %v1063_v58, %v1055_v59  ;;  %v1060_v36 = vadd.f32 %v1058_v30, %v1042_v60  ;;  %p1506_p11 = pnand %p1505_p8, %p2064_p10  ;;  %p1513_p7 = por %p1512_p6, %p1511_p1 }
 0x145   : > { %v1061_v5 = vadd.f32 %v1059_v62, %v1043_v61  ;;  %v1076_v6 = vmul.f32 %v1048_v52, %v1832_v13  ;;  %v1064_v9 = vmul.f32 %v1063_v58, %v1054_v2  ;;  %v1070_v10 = vmul.f32 %v1054_v2, %v1832_v13  ;;  %v1122_v13 = vpop.permute.xlu1 %1121 }
 0x146   : > { %v1073_v7 = vadd.f32 %v1071_v29, %v1069_v63  ;;  %v1079_v8 = vsub.f32 %v1075_v1, %v1077_v0  ;;  %v1074_v57 = vmul.f32 %v1054_v2, %v1834_v14  ;;  %v1125_v38 = vmul.f32 %v1122_v13, %v1113_v31  ;;  %p1507_p13 = pneg %p1506_p11 }
 0x147   : > { %v1067_v56 = vadd.f32 %v1065_v43, %v1061_v5  ;;  %v1066_v17 = vadd.f32 %v1064_v9, %v1060_v36  ;;  %v1072_v18 = vadd.f32 %v1070_v10, %v1068_v4  ;;  %v1124_v42 = vmul.f32 %v1117_v34, %v1112_v33 }
 0x148   : > { %v1083_v15 = vmul.f32 %v1081_v11, %v1073_v7  ;;  %v1078_v21 = vsub.f32 %v1074_v57, %v1076_v6  ;;  %v1089_v23 = vmul.f32 %v1087_v22, %v1079_v8  ;;  %v1129_v19 = vstv %s1128_s17  ;;  %p1514_p9 = pnand %p1513_p7, %p1507_p13 }
 0x149   : > { %v1082_v27 = vmul.f32 %v1081_v11, %v1072_v18 }
 0x14a   : > { %v1085_v16 = vadd.f32 %v1083_v15, %v1067_v56  ;;  %v1088_v14 = vmul.f32 %v1087_v22, %v1078_v21 }
 0x14b   : > { %v1084_v25 = vadd.f32 %v1082_v27, %v1066_v17 }
 0x14c   : > { %v1091_v32 = vadd.f32 %v1089_v23, %v1085_v16 }
 0x14d   : > { %v1090_v37 = vadd.f32 %v1088_v14, %v1084_v25 }
 0x14e   : > { %v1111_v35 = vmul.f32 %v1108_v3, %v1091_v32 }
 0x14f   : > { %v1110_v39 = vmul.f32 %v1103_v12, %v1090_v37 }
 0x150   : > { %v1127_v40 = vadd.f32 %v1125_v38, %v1111_v35 }
 0x151   : > { %v1126_v44 = vadd.f32 %v1124_v42, %v1110_v39 }
 0x152   : > { %v1131_v20 = vadd.f32 %v1129_v19, %v1127_v40 }
 0x153   : > { %v1130_v45 = vadd.f32 %v1129_v19, %v1126_v44 }
 0x154   : > { %1470 = vtanh.f32 %v1131_v20 }
 0x155   : > { %1472 = vtanh.f32 %v1130_v45 }
 0x15e   : > { %v1471_v41 = vpop.eup %1470 }
 0x15f   : > { %1135 = vst [vmem:[%s402_s24 + $0x8] sm:$0xff] %v1471_v41  ;;  %v1473_v46 = vpop.eup %1472 }
 0x160   : > { %1134 = vst [vmem:[%s402_s24] sm:$0xff] %v1473_v46 }
 0x161   : > { %1517 = shalt.err (!%p1514_p9)
}
 0x162   : > { %s1518_s21 = scalar_lea.hbm %s1995_s11, 256  ;;  %s1522_s22 = scalar_lea.hbm %s2052_s7, 512 }
 0x163   : > { %p1519_p12 = scmp.ne.s32.totalorder %s1995_s11, %s1518_s21  ;;  %p1523_p3 = scmp.lt.u32.totalorder %s1995_s11, %s2052_s7 }
 0x164   : > { %p1524_p5 = scmp.lt.u32.totalorder %s1522_s22, %s1518_s21  ;;  %p1526_p8 = scmp.lt.u32.totalorder %s1518_s21, %s1995_s11 }
 0x165   : > { %p1520_p0 = pnand %p1519_p12, %p2064_p10 }
 0x166   : > { %p1525_p4 = por %p1524_p5, %p1523_p3 }
 0x167   : > { %p1521_p2 = pneg %p1520_p0 }
 0x168   : > { %p1527_p11 = por %p1526_p8, %p1525_p4 }
 0x16a   : > { %p1528_p13 = pnand %p1527_p11, %p1521_p2 }
 0x16c   : > { %1531 = shalt.err (!%p1528_p13)
}
 0x16d   : > { %s1602_s6 = smov 128   ;;  %s1603_s9 = smov 8  }
 0x16e   : > { %1383 = dma.vmem_to_hbm [thread:$0]  (%p2064_p10), %s1997_s25, 256, %s1995_s11, %s1999_s13, %s1602_s6, %s1602_s6, %s1603_s9  }
 0x16f PF: > { %p1400_p1 = scmp.ge.s32.totalorder %s1590_s8, 2  ;;  %s1167_s18 = sand.u32 1, %s1570_s26  }
 0x170   : > { %p2065_p6 = scmp.ne.s32.totalorder %s2058_s14, 0  ;;  %s1168_s29 = scalar_lea.sflag [#allocation4], %s1167_s18 }
 0x172   : > { %p1393_p7 = pnand %p1400_p1, %p2065_p6 }
 0x174   : > { %1565 = dma.done.wait (!%p1393_p7), %s1168_s29, 256  }
 0x175   : > { %1567 = vsyncadd (!%p1393_p7), %s1168_s29, 4294967040  ;;  %s23_s8 = sadd.s32 1, %s1590_s8   ;;  %s2066_s26 = smov %s1574_s27 }
 0x176   : > { %p20_p9 = scmp.ge.s32.totalorder %s23_s8, 4   ;;  %s2067_s27 = smov %s1578_s28 }
 0x177   : > { %s2068_s28 = smov %s1700_s15  ;;  %s2069_s29 = smov %s1586_s30 }
 0x178   : > { %s2070_s30 = smov %s2072_s10  ;;  %22 = sbr.rel (!%p20_p9) target bundleno = 8 (0x8), region = 101 }
 0x17f   :  { %1173 = vsyncpa [#allocation4], 1 }
 0x180   :  { %1175 = vsyncpa [#allocation4 + $0x1], 1 }
 0x181   :  { %1176 = vsyncpa [#allocation5], 1 }
 0x182   :  { %1178 = vsyncpa [#allocation5 + $0x1], 1 }
 0x183   :  { %1179 = vsyncpa [#allocation7], 1 }

</bundles_post_ra>
